<compile_context>
chip_gen: v6e
topology: v6e:2x2x1
jax: 0.10.0
libtpu: 0.0.40
codegen_flags: <defaults>
</compile_context>

<pallas_src>
import jax
import jax.numpy as jnp
from jax.experimental import pallas as pl
from jax.experimental.pallas import tpu as pltpu


def _linear_kernel(x_ref, w_ref, b_ref, o_ref):
    # x_ref / o_ref: (block_rows, cols) lane-dense VMEM tiles.
    # w_ref / b_ref: (1,) f32 scalars in SMEM; scalar read, VPU broadcast.
    w = w_ref[0]
    b = b_ref[0]
    x = x_ref[...].astype(jnp.float32)
    o_ref[...] = (x * w + b).astype(o_ref.dtype)


_KERNEL_MIN_ELEMS = 256 * 1024  # below this, the kernel is pure launch overhead


def regression_model_forward(x, w, b, *, force_kernel=False):
    """Forward of nn.Linear(1, 1): y = x @ W^T + b.

    x: (N, 1), w: (1, 1) (out_features, in_features), b: (1,).
    Returns (N, 1) with x's dtype.
    """
    n, in_features = x.shape
    assert in_features == 1
    dtype = x.dtype

    # Keep the scalars f32 regardless of x's dtype (SMEM is 32-bit scalar
    # memory; also matches PyTorch's f32 Linear math).
    w_s = w.reshape(1).astype(jnp.float32)
    b_s = b.reshape(1).astype(jnp.float32)

    if not force_kernel and n < _KERNEL_MIN_ELEMS:
        # Small-N dispatch: one fused XLA FMA beats kernel launch + grid steps.
        y = x.astype(jnp.float32) * w_s[0] + b_s[0]
        return y.astype(dtype)

    # ---- lane-dense slab layout (last dim a multiple of 128) ----
    cols = 1024 if n >= 8 * 1024 else 128
    rows = pl.cdiv(n, cols)
    slab_elems = rows * cols

    if slab_elems == n:
        # Zero-copy fast path: bare reshape is a free bitcast.
        slab = x.reshape(rows, cols)
    else:
        # Ragged N: single pad of the flat vector up to rows*cols.
        flat = jnp.zeros((slab_elems,), dtype).at[:n].set(x.reshape(-1))
        slab = flat.reshape(rows, cols)

    # ---- row-block sizing ----
    target_block_rows = 1024  # 1024 x 1024 f32 = 4 MiB per buffer
    min_block_rows = 128
    if rows >= 2 * target_block_rows:
        block_rows = target_block_rows
    elif rows >= 2 * min_block_rows:
        # Split into >=2 roughly equal blocks so v7x's two TCs both stream.
        block_rows = ((pl.cdiv(rows, 2) + 7) // 8) * 8
    else:
        block_rows = rows  # single block (block_shape == full array dim)
    grid = (pl.cdiv(rows, block_rows),)

    out = pl.pallas_call(
        _linear_kernel,
        out_shape=jax.ShapeDtypeStruct((rows, cols), dtype),
        grid=grid,
        in_specs=[
            pl.BlockSpec((block_rows, cols), lambda i: (i, 0)),
            pl.BlockSpec(memory_space=pltpu.MemorySpace.SMEM),
            pl.BlockSpec(memory_space=pltpu.MemorySpace.SMEM),
        ],
        out_specs=pl.BlockSpec((block_rows, cols), lambda i: (i, 0)),
        compiler_params=pltpu.CompilerParams(
            dimension_semantics=("parallel",),
            vmem_limit_bytes=32 * 1024 * 1024,
        ),
        cost_estimate=pl.CostEstimate(
            flops=2 * slab_elems,
            bytes_accessed=2 * slab_elems * slab.dtype.itemsize,
            transcendentals=0,
        ),
    )(slab, w_s, b_s)

    if slab_elems == n:
        return out.reshape(n, 1)  # free reshape back to the (N, 1) column
    return out.reshape(-1)[:n].reshape(n, 1)


if __name__ == "__main__":
    key = jax.random.PRNGKey(0)
    kw, kb, kx = jax.random.split(key, 3)

    # nn.Linear(1, 1) init: U(-1/sqrt(fan_in), 1/sqrt(fan_in)) with fan_in = 1.
    w = jax.random.uniform(kw, (1, 1), jnp.float32, minval=-1.0, maxval=1.0)
    b = jax.random.uniform(kb, (1,), jnp.float32, minval=-1.0, maxval=1.0)

    # 1) Spec input from the PyTorch script: [5, 7, 12, 16, 20] as (-1, 1),
    #    forced through the Pallas kernel (exercises the ragged pad path).
    x_small = jnp.array([5.0, 7.0, 12.0, 16.0, 20.0], jnp.float32).reshape(-1, 1)
    y_small = regression_model_forward(x_small, w, b, force_kernel=True)
    jax.block_until_ready(y_small)
    ref_small = x_small @ w.T + b
    assert y_small.shape == ref_small.shape
    assert jnp.allclose(y_small, ref_small, atol=1e-5), (y_small, ref_small)

    # 1b) Same input through the auto-dispatch (plain XLA small-N fast path).
    y_small2 = regression_model_forward(x_small, w, b)
    jax.block_until_ready(y_small2)
    assert jnp.allclose(y_small2, ref_small, atol=1e-5)

    # 2) Kernel-path input: hits the zero-copy fast path (N % 1024 == 0) and a
    #    two-step "parallel" grid (rows=512 -> two 256x1024 blocks).
    n_big = 512 * 1024
    x_big = jax.random.normal(kx, (n_big, 1), jnp.float32)
    y_big = regression_model_forward(x_big, w, b)
    jax.block_until_ready(y_big)
    ref_big = x_big * w[0, 0] + b[0]
    assert jnp.allclose(y_big, ref_big, atol=1e-5), "mismatch on large input"

    print("KERNEL_OK")
</pallas_src>

<mosaic_0001>
module attributes {stable_mosaic.version = 11 : i64} {
  func.func @_linear_kernel(%arg0: i32, %arg1: memref<1x128xf32, #tpu.memory_space<vmem>>, %arg2: memref<1xf32, #tpu.memory_space<smem>>, %arg3: memref<1xf32, #tpu.memory_space<smem>>, %arg4: memref<1x128xf32, #tpu.memory_space<vmem>>) attributes {dimension_semantics = [#tpu.dimension_semantics<parallel>], iteration_bounds = array<i64: 1>, scalar_prefetch = 0 : i64, scratch_operands = 0 : i64, tpu.core_type = #tpu.core_type<tc>, window_params = [{transform_indices = @transform_0, window_bounds = array<i64: 1, 128>}, {transform_indices = @transform_1, window_bounds = array<i64: 1>}, {transform_indices = @transform_2, window_bounds = array<i64: 1>}, {transform_indices = @transform_3, window_bounds = array<i64: 1, 128>}]} {
    %c0 = arith.constant 0 : index
    %0 = memref.load %arg2[%c0] : memref<1xf32, #tpu.memory_space<smem>>
    %c0_0 = arith.constant 0 : index
    %1 = memref.load %arg3[%c0_0] : memref<1xf32, #tpu.memory_space<smem>>
    %c0_1 = arith.constant 0 : index
    %c0_2 = arith.constant 0 : index
    %2 = vector.load %arg1[%c0_1, %c0_2] : memref<1x128xf32, #tpu.memory_space<vmem>>, vector<1x128xf32>
    %3 = vector.broadcast %0 : f32 to vector<1x128xf32>
    %4 = arith.mulf %2, %3 : vector<1x128xf32>
    %5 = vector.broadcast %1 : f32 to vector<1x128xf32>
    %6 = arith.addf %4, %5 : vector<1x128xf32>
    %c0_3 = arith.constant 0 : index
    %c0_4 = arith.constant 0 : index
    %7 = vector.load %arg4[%c0_3, %c0_4] : memref<1x128xf32, #tpu.memory_space<vmem>>, vector<1x128xf32>
    tpu.vector_store %arg4[%c0_3, %c0_4], %6 {strides = array<i32>} : memref<1x128xf32, #tpu.memory_space<vmem>>, vector<1x128xf32>,
    return
  }
  func.func @transform_0(%arg0: i32) -> (i32, i32) {
    %c0_i32 = arith.constant 0 : i32
    %c0_i32_0 = arith.constant 0 : i32
    return %arg0, %c0_i32 : i32, i32
  }
  func.func @transform_1(%arg0: i32) -> i32 {
    %c0_i32 = arith.constant 0 : i32
    %c0_i32_0 = arith.constant 0 : i32
    return %c0_i32 : i32
  }
  func.func @transform_2(%arg0: i32) -> i32 {
    %c0_i32 = arith.constant 0 : i32
    %c0_i32_0 = arith.constant 0 : i32
    return %c0_i32 : i32
  }
  func.func @transform_3(%arg0: i32) -> (i32, i32) {
    %c0_i32 = arith.constant 0 : i32
    %c0_i32_0 = arith.constant 0 : i32
    return %arg0, %c0_i32 : i32, i32
  }
}

</mosaic_0001>

<bundles_post_ra>
// kernel: tpu_custom_call.1
= control target key start
LH: loop header
LB: loop body
LE: loop exit
PB: predicated region body
PF: predicated region fallthrough
CT: control target
= control target key end

     0   :  { %s95_s0 = inlined_call_operand.vmem [shape: f32[1,128], index: 0, kind: input, shape index: {}]   ;;  %s96_s1 = inlined_call_operand.<no memory space> [shape: f32[1], index: 1, kind: input, shape index: {}]   ;;  %s97_s2 = inlined_call_operand.<no memory space> [shape: f32[1], index: 2, kind: input, shape index: {}]   ;;  %s98_s3 = inlined_call_operand.hbm [shape: f32[1,128], index: 3, kind: output, shape index: {}]  }
   0x1   :  { %v19_v0 = vld [vmem:[%s95_s0] sm:$0x1]  ;;  %v20_v1 = vstv %s96_s1  ;;  %v22_v2 = vstv %s97_s2 }
   0x2   :  { %10 = vsyncpa [#allocation5], 0  ;;  %v21_v3 = vmul.f32 %v20_v1, %v19_v0  ;;  %s62_s18 = smov [#allocation4]  }
   0x3   :  { %s31_s19 = sshll.u32 %s62_s18, 4  ;;  %s32_s19 = int_to_ptr.vmem [resolvable:$true] %s31_s19 }
   0x4   :  { %v23_v4 = vadd.f32 %v22_v2, %v21_v3  ;;  %s40_s20 = scalar_lea.vmem %s32_s19, 16  ;;  %s44_s21 = scalar_lea.vmem %s32_s19, 32 }
   0x5   :  { %p41_p0 = scmp.ne.s32.totalorder %s32_s19, %s40_s20  ;;  %p45_p1 = scmp.lt.s32.totalorder %s32_s19, %s32_s19 }
   0x6   :  { %24 = vst [vmem:[#allocation4] sm:$0x1] %v23_v4  ;;  %p46_p2 = scmp.lt.s32.totalorder %s44_s21, %s40_s20 }
   0x8   :  { %p47_p3 = por %p46_p2, %p45_p1 }
   0xa   :  { %p48_p4 = pnand %p47_p3, %p41_p0 }
   0xc   :  { %51 = shalt.err (!%p48_p4)
}
   0xd   :  { %34 = dma.vmem_to_hbm [thread:$0]  %s32_s19, 16, %s98_s3, [#allocation5]  }
   0xe   :  { %60 = dma.done.wait [#allocation5], 16  }
   0xf   :  { %61 = vsyncadd [#allocation5], 4294967280 }
  0x10   :  { %38 = vsyncpa [#allocation5], 1 }

</bundles_post_ra>
